<compile_context>
chip_gen: v6e
topology: v6e:2x2x1
jax: 0.10.0
libtpu: 0.0.40
codegen_flags: <defaults>
</compile_context>

<pallas_src>
import jax
import jax.numpy as jnp
from jax.experimental import pallas as pl
from jax.experimental.pallas import tpu as pltpu


# Packed output layout along the lane axis: [d1 | d2 | d3 | output] = 40+20+10+2 = 72
_D1, _D2, _D3, _DOUT = 40, 20, 10, 2
_PACKED = _D1 + _D2 + _D3 + _DOUT


def spambase_kernel(x_ref,
                    w1_ref, b1_ref,
                    w2_ref, b2_ref,
                    w3_ref, b3_ref,
                    w4_ref, b4_ref,
                    packed_ref):
    """One batch tile: 4 fused Linear(+ReLU / Sigmoid) layers, weights VMEM-resident."""
    wdtype = w1_ref.dtype          # matmul operand dtype (bf16 or f32)
    x = x_ref[...]

    # dense1: Linear(57 -> 40) + ReLU   (f32 accumulate, f32 elementwise)
    z1 = jnp.dot(x, w1_ref[...], preferred_element_type=jnp.float32) + b1_ref[...]
    d1 = jnp.maximum(z1, 0.0)

    # dense2: Linear(40 -> 20) + ReLU
    z2 = jnp.dot(d1.astype(wdtype), w2_ref[...],
                 preferred_element_type=jnp.float32) + b2_ref[...]
    d2 = jnp.maximum(z2, 0.0)

    # dense3: Linear(20 -> 10) + ReLU
    z3 = jnp.dot(d2.astype(wdtype), w3_ref[...],
                 preferred_element_type=jnp.float32) + b3_ref[...]
    d3 = jnp.maximum(z3, 0.0)

    # classifier: Linear(10 -> 2) + Sigmoid (EUP exp + approx reciprocal; saturates to 0/1)
    z4 = jnp.dot(d3.astype(wdtype), w4_ref[...],
                 preferred_element_type=jnp.float32) + b4_ref[...]
    out = pl.reciprocal(1.0 + jnp.exp(-z4), approx=True)

    # Single lane-dense packed write per tile (one HBM output stream).
    packed_ref[:, 0:_D1] = d1
    packed_ref[:, _D1:_D1 + _D2] = d2
    packed_ref[:, _D1 + _D2:_D1 + _D2 + _D3] = d3
    packed_ref[:, _D1 + _D2 + _D3:_PACKED] = out


def _round_up(n, m):
    return ((n + m - 1) // m) * m


def prepare_params(params, use_bf16=True):
    """Hoist per-call glue: PyTorch [out,in] weights -> [in,out] (optionally bf16),
    biases -> [1,out] f32. Do this ONCE if params are reused across calls."""
    wdtype = jnp.bfloat16 if use_bf16 else jnp.float32
    prepped = []
    for w, b in params:
        prepped.append((jnp.asarray(w, jnp.float32).T.astype(wdtype),
                        jnp.asarray(b, jnp.float32).reshape(1, -1)))
    return tuple(prepped)


def spambase_forward(x, prepped_params, *, block_b=2048):
    """x: [B, 57] float32. prepped_params: from prepare_params().
    Returns (d1, d2, d3, output) in float32, matching the PyTorch forward."""
    B = x.shape[0]
    (w1, b1), (w2, b2), (w3, b3), (w4, b4) = prepped_params

    wdtype = w1.dtype
    x_in = x.astype(wdtype)   # bf16 halves HBM read bytes; accumulation is f32 in-kernel

    # Batch tile: multiple of 8 (sublane), large to amortize per-step overhead,
    # tiny VMEM footprint (few MB double-buffered) -> safe on v5e/v6e/v7x defaults.
    TB = min(block_b, _round_up(B, 8))
    Bp = _round_up(B, TB)
    if Bp != B:
        x_in = jnp.pad(x_in, ((0, Bp - B), (0, 0)))
    grid = (Bp // TB,)

    batch_map = lambda i: (i, 0)   # stream over batch tiles
    const_map = lambda i: (0, 0)   # weights/biases resident across the whole grid

    in_specs = [
        pl.BlockSpec((TB, 57), batch_map),
        pl.BlockSpec(w1.shape, const_map), pl.BlockSpec(b1.shape, const_map),
        pl.BlockSpec(w2.shape, const_map), pl.BlockSpec(b2.shape, const_map),
        pl.BlockSpec(w3.shape, const_map), pl.BlockSpec(b3.shape, const_map),
        pl.BlockSpec(w4.shape, const_map), pl.BlockSpec(b4.shape, const_map),
    ]
    out_specs = pl.BlockSpec((TB, _PACKED), batch_map)

    packed = pl.pallas_call(
        spambase_kernel,
        grid=grid,
        in_specs=in_specs,
        out_specs=out_specs,
        out_shape=jax.ShapeDtypeStruct((Bp, _PACKED), jnp.float32),
        compiler_params=pltpu.CompilerParams(
            dimension_semantics=("parallel",)),   # shard batch tiles across TCs (v7x)
    )(x_in, w1, b1, w2, b2, w3, b3, w4, b4)

    d1 = packed[:B, 0:_D1]
    d2 = packed[:B, _D1:_D1 + _D2]
    d3 = packed[:B, _D1 + _D2:_D1 + _D2 + _D3]
    out = packed[:B, _D1 + _D2 + _D3:_PACKED]
    return d1, d2, d3, out


def init_params(key):
    """Deterministic init mimicking PyTorch Linear default (U[-1/sqrt(fan_in), ...])."""
    dims = [(57, 40), (40, 20), (20, 10), (10, 2)]
    params = []
    for (fan_in, fan_out) in dims:
        key, kw, kb = jax.random.split(key, 3)
        bound = 1.0 / jnp.sqrt(float(fan_in))
        w = jax.random.uniform(kw, (fan_out, fan_in), jnp.float32, -bound, bound)
        b = jax.random.uniform(kb, (fan_out,), jnp.float32, -bound, bound)
        params.append((w, b))
    return params


def _reference(x, params):
    """Pure-JAX f32 reference with identical semantics to the PyTorch module."""
    h = x
    acts = []
    for i, (w, b) in enumerate(params):
        h = h @ w.T + b
        h = jnp.maximum(h, 0.0) if i < 3 else jax.nn.sigmoid(h)
        acts.append(h)
    return acts


def _check(tag, got, want, atol):
    err = float(jnp.max(jnp.abs(got - want)))
    assert err <= atol, f"{tag}: max abs err {err} > {atol}"


if __name__ == "__main__":
    key = jax.random.PRNGKey(0)
    k_x, k_x2, k_p = jax.random.split(key, 3)
    params = init_params(k_p)

    # --- small batch, single tile, exact f32 path ---
    B = 8
    x = jax.random.normal(k_x, (B, 57), jnp.float32)
    prepped_f32 = prepare_params(params, use_bf16=False)
    outs_f32 = spambase_forward(x, prepped_f32)
    jax.block_until_ready(outs_f32)

    refs = _reference(x, params)
    for tag, got, want in zip(("d1", "d2", "d3"), outs_f32[:3], refs[:3]):
        _check(f"f32 {tag}", got, want, atol=1e-5)
    _check("f32 out", outs_f32[3], refs[3], atol=2e-2)  # approx-reciprocal sigmoid

    # --- larger batch, multi-tile grid (with batch padding), bf16 operand path ---
    B2 = 1000
    x2 = jax.random.normal(k_x2, (B2, 57), jnp.float32)
    prepped_bf16 = prepare_params(params, use_bf16=True)
    outs_bf16 = spambase_forward(x2, prepped_bf16, block_b=256)
    jax.block_until_ready(outs_bf16)

    refs2 = _reference(x2, params)
    for tag, got, want in zip(("d1", "d2", "d3", "out"), outs_bf16, refs2):
        _check(f"bf16 {tag}", got, want, atol=2e-2)

    # TODO(synk): the PyTorch module also caches `self.output` on the module; stateless
    # JAX simply returns the outputs instead.
    print("KERNEL_OK")
</pallas_src>

<mosaic_0001>
module attributes {stable_mosaic.version = 11 : i64} {
  func.func @spambase_kernel(%arg0: i32, %arg1: memref<8x57xf32, #tpu.memory_space<vmem>>, %arg2: memref<57x40xf32, #tpu.memory_space<vmem>>, %arg3: memref<1x40xf32, #tpu.memory_space<vmem>>, %arg4: memref<40x20xf32, #tpu.memory_space<vmem>>, %arg5: memref<1x20xf32, #tpu.memory_space<vmem>>, %arg6: memref<20x10xf32, #tpu.memory_space<vmem>>, %arg7: memref<1x10xf32, #tpu.memory_space<vmem>>, %arg8: memref<10x2xf32, #tpu.memory_space<vmem>>, %arg9: memref<1x2xf32, #tpu.memory_space<vmem>>, %arg10: memref<8x72xf32, #tpu.memory_space<vmem>>) attributes {dimension_semantics = [#tpu.dimension_semantics<parallel>], iteration_bounds = array<i64: 1>, scalar_prefetch = 0 : i64, scratch_operands = 0 : i64, tpu.core_type = #tpu.core_type<tc>, window_params = [{transform_indices = @transform_0, window_bounds = array<i64: 8, 57>}, {pipeline_mode = #tpu.pipeline_mode<synchronous>, transform_indices = @transform_1, window_bounds = array<i64: 57, 40>}, {pipeline_mode = #tpu.pipeline_mode<synchronous>, transform_indices = @transform_2, window_bounds = array<i64: 1, 40>}, {pipeline_mode = #tpu.pipeline_mode<synchronous>, transform_indices = @transform_3, window_bounds = array<i64: 40, 20>}, {pipeline_mode = #tpu.pipeline_mode<synchronous>, transform_indices = @transform_4, window_bounds = array<i64: 1, 20>}, {pipeline_mode = #tpu.pipeline_mode<synchronous>, transform_indices = @transform_5, window_bounds = array<i64: 20, 10>}, {pipeline_mode = #tpu.pipeline_mode<synchronous>, transform_indices = @transform_6, window_bounds = array<i64: 1, 10>}, {pipeline_mode = #tpu.pipeline_mode<synchronous>, transform_indices = @transform_7, window_bounds = array<i64: 10, 2>}, {pipeline_mode = #tpu.pipeline_mode<synchronous>, transform_indices = @transform_8, window_bounds = array<i64: 1, 2>}, {transform_indices = @transform_9, window_bounds = array<i64: 8, 72>}]} {
    %c0 = arith.constant 0 : index
    %c0_0 = arith.constant 0 : index
    %0 = vector.load %arg1[%c0, %c0_0] : memref<8x57xf32, #tpu.memory_space<vmem>>, vector<8x57xf32>
    %c0_1 = arith.constant 0 : index
    %c0_2 = arith.constant 0 : index
    %1 = vector.load %arg2[%c0_1, %c0_2] : memref<57x40xf32, #tpu.memory_space<vmem>>, vector<57x40xf32>
    %cst = arith.constant dense<0.000000e+00> : vector<8x40xf32>
    %2 = tpu.matmul %0, %1, %cst {dimension_numbers = #tpu.dot_dimension_numbers<[1], [0], [0], [1], [0, 0, 1, 1], [], []>} : vector<8x57xf32>, vector<57x40xf32>, vector<8x40xf32> -> vector<8x40xf32>
    %c0_3 = arith.constant 0 : index
    %c0_4 = arith.constant 0 : index
    %3 = vector.load %arg3[%c0_3, %c0_4] : memref<1x40xf32, #tpu.memory_space<vmem>>, vector<1x40xf32>
    %4 = vector.broadcast %3 : vector<1x40xf32> to vector<8x40xf32>
    %5 = arith.addf %2, %4 : vector<8x40xf32>
    %cst_5 = arith.constant 0.000000e+00 : f32
    %6 = vector.broadcast %cst_5 : f32 to vector<8x40xf32>
    %7 = arith.maximumf %5, %6 : vector<8x40xf32>
    %c0_6 = arith.constant 0 : index
    %c0_7 = arith.constant 0 : index
    %8 = vector.load %arg4[%c0_6, %c0_7] : memref<40x20xf32, #tpu.memory_space<vmem>>, vector<40x20xf32>
    %cst_8 = arith.constant dense<0.000000e+00> : vector<8x20xf32>
    %9 = tpu.matmul %7, %8, %cst_8 {dimension_numbers = #tpu.dot_dimension_numbers<[1], [0], [0], [1], [0, 0, 1, 1], [], []>} : vector<8x40xf32>, vector<40x20xf32>, vector<8x20xf32> -> vector<8x20xf32>
    %c0_9 = arith.constant 0 : index
    %c0_10 = arith.constant 0 : index
    %10 = vector.load %arg5[%c0_9, %c0_10] : memref<1x20xf32, #tpu.memory_space<vmem>>, vector<1x20xf32>
    %11 = vector.broadcast %10 : vector<1x20xf32> to vector<8x20xf32>
    %12 = arith.addf %9, %11 : vector<8x20xf32>
    %cst_11 = arith.constant 0.000000e+00 : f32
    %13 = vector.broadcast %cst_11 : f32 to vector<8x20xf32>
    %14 = arith.maximumf %12, %13 : vector<8x20xf32>
    %c0_12 = arith.constant 0 : index
    %c0_13 = arith.constant 0 : index
    %15 = vector.load %arg6[%c0_12, %c0_13] : memref<20x10xf32, #tpu.memory_space<vmem>>, vector<20x10xf32>
    %cst_14 = arith.constant dense<0.000000e+00> : vector<8x10xf32>
    %16 = tpu.matmul %14, %15, %cst_14 {dimension_numbers = #tpu.dot_dimension_numbers<[1], [0], [0], [1], [0, 0, 1, 1], [], []>} : vector<8x20xf32>, vector<20x10xf32>, vector<8x10xf32> -> vector<8x10xf32>
    %c0_15 = arith.constant 0 : index
    %c0_16 = arith.constant 0 : index
    %17 = vector.load %arg7[%c0_15, %c0_16] : memref<1x10xf32, #tpu.memory_space<vmem>>, vector<1x10xf32>
    %18 = vector.broadcast %17 : vector<1x10xf32> to vector<8x10xf32>
    %19 = arith.addf %16, %18 : vector<8x10xf32>
    %cst_17 = arith.constant 0.000000e+00 : f32
    %20 = vector.broadcast %cst_17 : f32 to vector<8x10xf32>
    %21 = arith.maximumf %19, %20 : vector<8x10xf32>
    %c0_18 = arith.constant 0 : index
    %c0_19 = arith.constant 0 : index
    %22 = vector.load %arg8[%c0_18, %c0_19] : memref<10x2xf32, #tpu.memory_space<vmem>>, vector<10x2xf32>
    %cst_20 = arith.constant dense<0.000000e+00> : vector<8x2xf32>
    %23 = tpu.matmul %21, %22, %cst_20 {dimension_numbers = #tpu.dot_dimension_numbers<[1], [0], [0], [1], [0, 0, 1, 1], [], []>} : vector<8x10xf32>, vector<10x2xf32>, vector<8x2xf32> -> vector<8x2xf32>
    %c0_21 = arith.constant 0 : index
    %c0_22 = arith.constant 0 : index
    %24 = vector.load %arg9[%c0_21, %c0_22] : memref<1x2xf32, #tpu.memory_space<vmem>>, vector<1x2xf32>
    %25 = vector.broadcast %24 : vector<1x2xf32> to vector<8x2xf32>
    %26 = arith.addf %23, %25 : vector<8x2xf32>
    %cst_23 = arith.constant 0.000000e+00 : f32
    %27 = vector.broadcast %cst_23 : f32 to vector<8x2xf32>
    %28 = arith.subf %27, %26 : vector<8x2xf32>
    %29 = math.exp %28 : vector<8x2xf32>
    %cst_24 = arith.constant 1.000000e+00 : f32
    %30 = vector.broadcast %cst_24 : f32 to vector<8x2xf32>
    %31 = arith.addf %30, %29 : vector<8x2xf32>
    %32 = tpu.reciprocal %31 {approx = true} : vector<8x2xf32> -> vector<8x2xf32>
    %c0_25 = arith.constant 0 : index
    %c0_26 = arith.constant 0 : index
    %33 = vector.load %arg10[%c0_25, %c0_26] : memref<8x72xf32, #tpu.memory_space<vmem>>, vector<8x40xf32>
    tpu.vector_store %arg10[%c0_25, %c0_26], %7 {strides = array<i32>} : memref<8x72xf32, #tpu.memory_space<vmem>>, vector<8x40xf32>,
    %c0_27 = arith.constant 0 : index
    %c40 = arith.constant 40 : index
    %34 = vector.load %arg10[%c0_27, %c40] : memref<8x72xf32, #tpu.memory_space<vmem>>, vector<8x20xf32>
    tpu.vector_store %arg10[%c0_27, %c40], %14 {strides = array<i32>} : memref<8x72xf32, #tpu.memory_space<vmem>>, vector<8x20xf32>,
    %c0_28 = arith.constant 0 : index
    %c60 = arith.constant 60 : index
    %35 = vector.load %arg10[%c0_28, %c60] : memref<8x72xf32, #tpu.memory_space<vmem>>, vector<8x10xf32>
    tpu.vector_store %arg10[%c0_28, %c60], %21 {strides = array<i32>} : memref<8x72xf32, #tpu.memory_space<vmem>>, vector<8x10xf32>,
    %c0_29 = arith.constant 0 : index
    %c70 = arith.constant 70 : index
    %36 = vector.load %arg10[%c0_29, %c70] : memref<8x72xf32, #tpu.memory_space<vmem>>, vector<8x2xf32>
    tpu.vector_store %arg10[%c0_29, %c70], %32 {strides = array<i32>} : memref<8x72xf32, #tpu.memory_space<vmem>>, vector<8x2xf32>,
    return
  }
  func.func @transform_0(%arg0: i32) -> (i32, i32) {
    %c0_i32 = arith.constant 0 : i32
    %c0_i32_0 = arith.constant 0 : i32
    return %arg0, %c0_i32 : i32, i32
  }
  func.func @transform_1(%arg0: i32) -> (i32, i32) {
    %c0_i32 = arith.constant 0 : i32
    %c0_i32_0 = arith.constant 0 : i32
    %c0_i32_1 = arith.constant 0 : i32
    return %c0_i32, %c0_i32_0 : i32, i32
  }
  func.func @transform_2(%arg0: i32) -> (i32, i32) {
    %c0_i32 = arith.constant 0 : i32
    %c0_i32_0 = arith.constant 0 : i32
    %c0_i32_1 = arith.constant 0 : i32
    return %c0_i32, %c0_i32_0 : i32, i32
  }
  func.func @transform_3(%arg0: i32) -> (i32, i32) {
    %c0_i32 = arith.constant 0 : i32
    %c0_i32_0 = arith.constant 0 : i32
    %c0_i32_1 = arith.constant 0 : i32
    return %c0_i32, %c0_i32_0 : i32, i32
  }
  func.func @transform_4(%arg0: i32) -> (i32, i32) {
    %c0_i32 = arith.constant 0 : i32
    %c0_i32_0 = arith.constant 0 : i32
    %c0_i32_1 = arith.constant 0 : i32
    return %c0_i32, %c0_i32_0 : i32, i32
  }
  func.func @transform_5(%arg0: i32) -> (i32, i32) {
    %c0_i32 = arith.constant 0 : i32
    %c0_i32_0 = arith.constant 0 : i32
    %c0_i32_1 = arith.constant 0 : i32
    return %c0_i32, %c0_i32_0 : i32, i32
  }
  func.func @transform_6(%arg0: i32) -> (i32, i32) {
    %c0_i32 = arith.constant 0 : i32
    %c0_i32_0 = arith.constant 0 : i32
    %c0_i32_1 = arith.constant 0 : i32
    return %c0_i32, %c0_i32_0 : i32, i32
  }
  func.func @transform_7(%arg0: i32) -> (i32, i32) {
    %c0_i32 = arith.constant 0 : i32
    %c0_i32_0 = arith.constant 0 : i32
    %c0_i32_1 = arith.constant 0 : i32
    return %c0_i32, %c0_i32_0 : i32, i32
  }
  func.func @transform_8(%arg0: i32) -> (i32, i32) {
    %c0_i32 = arith.constant 0 : i32
    %c0_i32_0 = arith.constant 0 : i32
    %c0_i32_1 = arith.constant 0 : i32
    return %c0_i32, %c0_i32_0 : i32, i32
  }
  func.func @transform_9(%arg0: i32) -> (i32, i32) {
    %c0_i32 = arith.constant 0 : i32
    %c0_i32_0 = arith.constant 0 : i32
    return %arg0, %c0_i32 : i32, i32
  }
}

</mosaic_0001>

<bundles_post_ra>
// kernel: tpu_custom_call.1
= control target key start
LH: loop header
LB: loop body
LE: loop exit
PB: predicated region body
PF: predicated region fallthrough
CT: control target
= control target key end

     0   :  { %vm53_vm0 = vcmask 1040384   ;;  %v540_v1 = vmov 0.0   ;;  %vm541_vm1 = vmmov 0   ;;  %s694_s0 = inlined_call_operand.vmem [shape: f32[8,57], index: 0, kind: input, shape index: {}]   ;;  %s695_s1 = inlined_call_operand.vmem [shape: f32[57,40], index: 1, kind: input, shape index: {}]   ;;  %s696_s2 = inlined_call_operand.vmem [shape: f32[1,40], index: 2, kind: input, shape index: {}]   ;;  %s697_s3 = inlined_call_operand.vmem [shape: f32[40,20], index: 3, kind: input, shape index: {}]   ;;  %s698_s4 = inlined_call_operand.vmem [shape: f32[1,20], index: 4, kind: input, shape index: {}]   ;;  %s699_s5 = inlined_call_operand.vmem [shape: f32[20,10], index: 5, kind: input, shape index: {}]   ;;  %s700_s6 = inlined_call_operand.vmem [shape: f32[1,10], index: 6, kind: input, shape index: {}]   ;;  %s701_s7 = inlined_call_operand.vmem [shape: f32[10,2], index: 7, kind: input, shape index: {}]   ;;  %s702_s8 = inlined_call_operand.vmem [shape: f32[1,2], index: 8, kind: input, shape index: {}]   ;;  %s703_s9 = inlined_call_operand.hbm [shape: f32[8,72], index: 9, kind: output, shape index: {}]  }
   0x1   :  { %v41_v0 = vld [vmem:[%s695_s1 + $0x38] sm:$0x1]  ;;  %460 = vmatprep.subr.mxu0 %v540_v1  ;;  %v40_v2 = vld [vmem:[%s695_s1 + $0x30] sm:$0xff]  ;;  %479 = vmatprep.subr.mxu1 %v540_v1  ;;  %v39_v3 = vld [vmem:[%s695_s1 + $0x28] sm:$0xff] }
   0x2   :  { %461 = vmatpush3.msk.msra.mxu0 %vm53_vm0, %v41_v0  ;;  %476 = vmatprep.mubr.msk.f32.mxu0 %vm541_vm1, %v540_v1  ;;  %v132_v4 = vld [vmem:[%s697_s3 + $0x20] sm:$0xff]  ;;  %v131_v5 = vld [vmem:[%s697_s3 + $0x18] sm:$0xff] }
   0x3   :  { %462 = vmatprep.subr.mxu0 %v540_v1  ;;  %489 = vmatprep.mubr.msk.f32.mxu1 %vm541_vm1, %v540_v1 }
   0x4   :  { %463 = vmatpush3.msra.mxu0 %v40_v2  ;;  %480 = vmatpush3.msra.mxu1 %v132_v4 }
   0x5   :  { %14 = vsyncpa [#allocation3], 0  ;;  %464 = vmatprep.subr.mxu0 %v540_v1  ;;  %v38_v6 = vld [vmem:[%s695_s1 + $0x20] sm:$0xff]  ;;  %481 = vmatprep.subr.mxu1 %v540_v1  ;;  %v37_v7 = vld [vmem:[%s695_s1 + $0x18] sm:$0xff]  ;;  %vm49_vm2 = vcmask 465920   ;;  %vm140_vm3 = vcmask 326656  }
   0x6   :  { %465 = vmatpush3.msra.mxu0 %v39_v3  ;;  %482 = vmatpush3.msra.mxu1 %v131_v5  ;;  %v36_v8 = vld [vmem:[%s695_s1 + $0x10] sm:$0xff]  ;;  %v35_v9 = vld [vmem:[%s695_s1 + $0x8] sm:$0xff]  ;;  %v34_v10 = vld [vmem:[%s695_s1] sm:$0xff]  ;;  %vm229_vm4 = vcmask 1043456   ;;  %vm225_vm5 = vcmask 162816   ;;  %s542_s22 = smov 40  }
   0x7   :  { %466 = vmatprep.subr.mxu0 %v540_v1  ;;  %483 = vmatprep.subr.mxu1 %v540_v1  ;;  %v33_v11 = vld [vmem:[%s694_s0] sm:$0xff]  ;;  %v130_v12 = vld [vmem:[%s697_s3 + $0x10] sm:$0xff]  ;;  %v129_v13 = vld [vmem:[%s697_s3 + $0x8] sm:$0xff]  ;;  %vm317_vm6 = vcmask 1041408   ;;  %vm400_vm7 = vcmask 490816   ;;  %vm313_vm8 = vcmask 80896  }
   0x8   :  { %467 = vmatpush3.msra.mxu0 %v38_v6  ;;  %484 = vmatpush3.msra.mxu1 %v130_v12  ;;  %v128_v14 = vld [vmem:[%s697_s3] sm:$0xff]  ;;  %v217_v20 = vld [vmem:[%s699_s5 + $0x10] sm:$0xf]  ;;  %v216_v21 = vld [vmem:[%s699_s5 + $0x8] sm:$0xff]  ;;  %s543_s27 = smov 60   ;;  %vm405_vm9 = vcmask 572896  }
   0x9   :  { %468 = vmatprep.subr.mxu0 %v540_v1  ;;  %485 = vmatprep.subr.mxu1 %v540_v1  ;;  %v427_v15 = vld [vmem:[%s696_s2] ss:$0 sm:$0xff]  ;;  %v305_v28 = vld [vmem:[%s701_s7 + $0x8] sm:$0x3]  ;;  %s545_s29 = smov [#allocation2]   ;;  %vm411_vm10 = vcmask 589360  }
   0xa   :  { %469 = vmatpush3.msra.mxu0 %v37_v7  ;;  %486 = vmatpush3.msra.mxu1 %v129_v13  ;;  %v215_v22 = vld [vmem:[%s699_s5] sm:$0xff]  ;;  %s419_s30 = sshll.u32 %s545_s29, 4  ;;  %s420_s30 = int_to_ptr.vmem [resolvable:$true] %s419_s30 }
   0xb   :  { %470 = vmatprep.subr.mxu0 %v540_v1  ;;  %487 = vmatprep.subr.mxu1 %v540_v1  ;;  %v430_v23 = vld [vmem:[%s698_s4] ss:$0 sm:$0xff]  ;;  %s518_s10 = scalar_lea.vmem %s420_s30, 128  ;;  %p523_p1 = scmp.lt.s32.totalorder %s420_s30, %s420_s30 }
   0xc   :  { %471 = vmatpush3.msra.mxu0 %v36_v8  ;;  %488 = vmatpush3.msra.mxu1 %v128_v14  ;;  %v304_v29 = vld [vmem:[%s701_s7] sm:$0xff]  ;;  %p519_p0 = scmp.ne.s32.totalorder %s420_s30, %s518_s10  ;;  %p524_p2 = scmp.lt.s32.totalorder %s518_s10, %s518_s10 }
   0xd   :  { %472 = vmatprep.subr.mxu0 %v540_v1  ;;  %492 = vmatprep.subr.mxu1 %v540_v1  ;;  %v432_v31 = vld [vmem:[%s700_s6] ss:$0 sm:$0xff]  ;;  %s544_s6 = smov 70  }
   0xe   :  { %473 = vmatpush3.msra.mxu0 %v35_v9  ;;  %v435_v37 = vld [vmem:[%s702_s8] ss:$0 sm:$0xff]  ;;  %p525_p3 = por %p524_p2, %p523_p1 }
   0xf   :  { %474 = vmatprep.subr.mxu0 %v540_v1 }
  0x10   :  { %475 = vmatpush3.msra.mxu0 %v34_v10  ;;  %p526_p4 = pnand %p525_p3, %p519_p0 }
  0x11   :  { %477 = vmatmul.mubr.msk.f32.vlgmr.msra.gmra.mxu0 %vm49_vm2, %v33_v11  ;;  %501 = vmatprep.subr.mxu0 %v540_v1 }
  0x12   :  { %505 = vmatprep.mubr.msk.f32.mxu0 %vm541_vm1, %v540_v1  ;;  %502 = vmatpush3.msk.msra.mxu0 %vm317_vm6, %v305_v28 }
  0x13   :  { %503 = vmatprep.subr.mxu0 %v540_v1 }
  0x14   :  { %504 = vmatpush3.msra.mxu0 %v304_v29 }
  0xd1   :  { %v123_v16 = vpop.f32.mrf.mxu0 }
  0xd2   :  { %v124_v17 = vadd.f32 %v427_v15, %v123_v16 }
  0xd3   :  { %v478_v18 = vpop.f32.mrf.mxu0 }
  0xd4   :  { %v127_v19 = vmax.f32 %v124_v17, 0.0 }
  0xd6   :  { %396 = vst.msk [vmem:[#allocation2] sm:$0xff] %vm140_vm3, %v127_v19  ;;  %490 = vmatmul.mubr.msk.f32.vlgmr.msra.gmra.mxu1 %vm140_vm3, %v127_v19 }
  0xd7   :  { %498 = vmatprep.mubr.msk.f32.mxu1 %vm541_vm1, %v540_v1  ;;  %493 = vmatpush3.msk.msra.mxu1 %vm229_vm4, %v217_v20 }
  0xd8   :  { %494 = vmatprep.subr.mxu1 %v540_v1 }
  0xd9   :  { %495 = vmatpush3.msra.mxu1 %v216_v21 }
  0xda   :  { %496 = vmatprep.subr.mxu1 %v540_v1 }
  0xdb   :  { %497 = vmatpush3.msra.mxu1 %v215_v22 }
 0x196   :  { %v210_v24 = vpop.f32.mrf.mxu1 }
 0x197   :  { %v211_v25 = vadd.f32 %v430_v23, %v210_v24 }
 0x198   :  { %v491_v26 = vpop.f32.mrf.mxu1 }
 0x199   :  { %v214_v27 = vmax.f32 %v211_v25, 0.0 }
 0x19b   :  { %397 = vrot.lane.b32.xlu0 %v214_v27, %s542_s22  ;;  %499 = vmatmul.mubr.msk.f32.vlgmr.msra.gmra.mxu1 %vm225_vm5, %v214_v27 }
 0x20d   :  { %v398_v30 = vpop.permute.xlu0 %397 }
 0x20e   :  { %401 = vst.msk [vmem:[#allocation2] sm:$0xff] %vm400_vm7, %v398_v30 }
 0x25b   :  { %v299_v32 = vpop.f32.mrf.mxu1 }
 0x25c   :  { %v300_v33 = vadd.f32 %v432_v31, %v299_v32 }
 0x25d   :  { %v500_v34 = vpop.f32.mrf.mxu1 }
 0x25e   :  { %v303_v35 = vmax.f32 %v300_v33, 0.0 }
 0x260   :  { %402 = vrot.lane.b32.xlu0 %v303_v35, %s543_s27  ;;  %506 = vmatmul.mubr.msk.f32.vlgmr.msra.gmra.mxu0 %vm313_vm8, %v303_v35 }
 0x2d2   :  { %v403_v36 = vpop.permute.xlu0 %402 }
 0x2d3   :  { %406 = vst.msk [vmem:[#allocation2] sm:$0xff] %vm405_vm9, %v403_v36 }
 0x320   :  { %v387_v38 = vpop.f32.mrf.mxu0 }
 0x321   :  { %v388_v39 = vadd.f32 %v435_v37, %v387_v38 }
 0x322   :  { %v507_v40 = vpop.f32.mrf.mxu0 }
 0x323   :  { %v391_v41 = vsub.f32 0.0, %v388_v39 }
 0x325   :  { %v392_v42 = vmul.f32 1.442695, %v391_v41 }
 0x327   :  { %514 = vpow2.f32 %v392_v42 }
 0x334   :  { %v515_v43 = vpop.eup %514 }
 0x335   :  { %v394_v44 = vadd.f32 1.0, %v515_v43 }
 0x337   :  { %516 = vrcp.f32 %v394_v44 }
 0x344   :  { %v517_v45 = vpop.eup %516 }
 0x345   :  { %408 = vrot.lane.b32.xlu1 %v517_v45, %s544_s6 }
 0x3b7   :  { %v409_v46 = vpop.permute.xlu1 %408 }
 0x3b8   :  { %412 = vst.msk [vmem:[#allocation2] sm:$0xff] %vm411_vm10, %v409_v46 }
 0x3b9   :  { %529 = shalt.err (!%p526_p4)
}
 0x3ba   :  { %422 = dma.vmem_to_hbm [thread:$0]  %s420_s30, 128, %s703_s9, [#allocation3]  }
 0x3bb   :  { %538 = dma.done.wait [#allocation3], 128  }
 0x3bc   :  { %539 = vsyncadd [#allocation3], 4294967168 }
 0x3bd   :  { %426 = vsyncpa [#allocation3], 1 }

</bundles_post_ra>
